<compile_context>
chip_gen: v7x
topology: tpu7x:2x2x1
jax: 0.10.0
libtpu: 0.0.40
codegen_flags: <defaults>
</compile_context>

<pallas_src>
import functools
import math

import jax
import jax.numpy as jnp
from jax import lax
from jax.experimental import pallas as pl
from jax.experimental.pallas import tpu as pltpu

_LANES = 128
_SUBLANES = 8
_TARGET_TILE_BYTES = 3 * 1024 * 1024   # per-input tile (2 inputs x 2 buffers ~= 12 MiB)
_CHUNK_ELEMS = 32 * 1024               # inner-loop chunk (~128 KiB of f32 work)
_VMEM_LIMIT_BYTES = 40 * 1024 * 1024   # headroom on all of v5e/v6e/v7x


def _round_up(v, m):
    return -(-v // m) * m


def _round_down(v, m):
    return (v // m) * m


def _focal_kernel(x_ref, t_ref, out_ref, *, gamma, alpha, tile_rows, chunk_rows,
                  cols, full_rows, rem_lanes, num_tiles, needs_mask):
    """One grid step: reduce a (tile_rows, cols) slab to an (8, cols) partial sum."""
    tile_start = pl.program_id(0) * tile_rows
    nchunks = tile_rows // chunk_rows

    def chunk_loss(x, t):
        x = x.astype(jnp.float32)
        t = t.astype(jnp.float32)
        # BCE with logits: x - x*t + softplus(-x)  (== x - x*t + max_val + log_)
        softplus_neg_x = jnp.maximum(-x, 0.0) + jnp.log1p(jnp.exp(-jnp.abs(x)))
        loss = x - x * t + softplus_neg_x
        # Modulating factor: exp(gamma * logsigmoid(z)),  z = -x * (2t - 1)
        z = -x * (t * 2.0 - 1.0)
        if gamma == 2.0:
            # sigmoid(z)^2 : one exp + one divide + a VPU square.
            sig = 1.0 / (1.0 + jnp.exp(-jnp.maximum(z, -80.0)))
            mod = sig * sig
        else:
            logsig = jnp.minimum(z, 0.0) - jnp.log1p(jnp.exp(-jnp.abs(z)))
            mod = jnp.exp(logsig * gamma)
        return alpha * mod * loss

    def compute(masked):
        def step(r0, acc):
            loss = chunk_loss(x_ref[pl.ds(r0, chunk_rows), :],
                              t_ref[pl.ds(r0, chunk_rows), :])
            if masked:
                # Row/lane based mask (no flat index -> no int32 overflow).
                row = (tile_start + r0
                       + lax.broadcasted_iota(jnp.int32, (chunk_rows, cols), 0))
                lane = lax.broadcasted_iota(jnp.int32, (chunk_rows, cols), 1)
                valid = (row < full_rows) | ((row == full_rows) & (lane < rem_lanes))
                loss = jnp.where(valid, loss, 0.0)
            # Sublane-aligned fold: (chunk_rows, cols) -> (8, cols), pure VPU adds.
            return acc + loss.reshape(chunk_rows // _SUBLANES, _SUBLANES, cols).sum(axis=0)

        acc0 = jnp.zeros((_SUBLANES, cols), jnp.float32)
        if nchunks == 1:
            return step(0, acc0)

        def body(c, acc):
            return step(pl.multiple_of(c * chunk_rows, chunk_rows), acc)

        return lax.fori_loop(0, nchunks, body, acc0)

    if not needs_mask:
        out_ref[...] = compute(False)
    elif num_tiles == 1:
        out_ref[...] = compute(True)
    else:
        # Only the last grid step pays for the tail mask.
        is_last = pl.program_id(0) == num_tiles - 1

        @pl.when(jnp.logical_not(is_last))
        def _():
            out_ref[...] = compute(False)

        @pl.when(is_last)
        def _():
            out_ref[...] = compute(True)


def _choose_tiling(rows2d, cols2d, itemsize):
    lane_cols = _round_up(cols2d, _LANES)
    chunk_rows = max(_SUBLANES,
                     min(512, _round_down(_CHUNK_ELEMS // lane_cols, _SUBLANES)))
    chunk_rows = min(chunk_rows, _round_up(rows2d, _SUBLANES))
    want_rows = max(chunk_rows,
                    _round_down(_TARGET_TILE_BYTES // (lane_cols * itemsize),
                                chunk_rows))
    tile_rows = min(want_rows, _round_up(rows2d, chunk_rows))
    num_tiles = -(-rows2d // tile_rows)
    # Prefer >= 2 grid steps when there is enough work so the "parallel" grid
    # axis can be sharded across both v7x TensorCores.
    if num_tiles == 1 and rows2d >= 2 * chunk_rows:
        half = _round_up(-(-rows2d // 2), chunk_rows)
        if half < tile_rows:
            tile_rows = half
            num_tiles = -(-rows2d // tile_rows)
    return tile_rows, chunk_rows, num_tiles


@functools.partial(jax.jit, static_argnums=(2, 3))
def _focal_loss_impl(outputs, targets, gamma, alpha):
    if outputs.ndim == 0:
        outputs = outputs.reshape(1, 1)
        targets = targets.reshape(1, 1)
    shape = outputs.shape
    e = int(math.prod(shape))
    num_rows = int(math.prod(shape[:-1]))      # mean divisor: prod(shape[:-1])
    cols_in = int(shape[-1])

    if e == 0:
        # sum over empty last dim -> zeros; mean over zero rows -> nan.
        return jnp.float32(0.0) if num_rows > 0 else jnp.float32(jnp.nan)

    itemsize = max(jnp.dtype(outputs.dtype).itemsize,
                   jnp.dtype(targets.dtype).itemsize)
    lane_cols_native = _round_up(cols_in, _LANES)
    native_ok = (cols_in >= _LANES
                 and lane_cols_native * itemsize * _SUBLANES <= _TARGET_TILE_BYTES)

    if native_ok:
        # Native path: merge only the leading dims (no flatten / pad relayout
        # passes over HBM); ragged row tail handled by in-kernel masking of the
        # last grid tile.
        rows2d, cols2d = num_rows, cols_in
        x2d = outputs.reshape(rows2d, cols2d)
        t2d = targets.reshape(rows2d, cols2d)
        full_rows, rem_lanes = rows2d, 0
    else:
        # Fallback for tiny/odd last dims: lane-pack into (rows, 128).  The pad
        # is at most one sublane group (8*128 - 1 elements), not a full tile.
        e_pad = _round_up(e, _SUBLANES * _LANES)
        x = outputs.reshape(-1)
        t = targets.reshape(-1)
        if e_pad != e:
            x = jnp.pad(x, (0, e_pad - e))
            t = jnp.pad(t, (0, e_pad - e))
        rows2d, cols2d = e_pad // _LANES, _LANES
        x2d = x.reshape(rows2d, cols2d)
        t2d = t.reshape(rows2d, cols2d)
        full_rows, rem_lanes = e // _LANES, e % _LANES

    tile_rows, chunk_rows, num_tiles = _choose_tiling(rows2d, cols2d, itemsize)
    needs_mask = (full_rows != tile_rows * num_tiles) or (rem_lanes != 0)

    kernel = functools.partial(
        _focal_kernel,
        gamma=float(gamma), alpha=float(alpha),
        tile_rows=tile_rows, chunk_rows=chunk_rows, cols=cols2d,
        full_rows=full_rows, rem_lanes=rem_lanes,
        num_tiles=num_tiles, needs_mask=needs_mask,
    )

    partials = pl.pallas_call(
        kernel,
        out_shape=jax.ShapeDtypeStruct((num_tiles * _SUBLANES, cols2d), jnp.float32),
        grid_spec=pltpu.PrefetchScalarGridSpec(
            num_scalar_prefetch=0,
            grid=(num_tiles,),
            in_specs=[
                pl.BlockSpec((tile_rows, cols2d), lambda i: (i, 0)),
                pl.BlockSpec((tile_rows, cols2d), lambda i: (i, 0)),
            ],
            out_specs=pl.BlockSpec((_SUBLANES, cols2d), lambda i: (i, 0)),
        ),
        compiler_params=pltpu.CompilerParams(
            dimension_semantics=("parallel",),
            vmem_limit_bytes=_VMEM_LIMIT_BYTES,
        ),
    )(x2d, t2d)

    # Tiny final reduce + mean divisor in the wrapper (keeps the grid fully
    # parallel so v7x can shard it across both TensorCores).
    return jnp.sum(partials) / jnp.float32(num_rows)


def focal_loss(outputs, targets, *, gamma=2.0, alpha=0.75):
    if targets.shape != outputs.shape:
        raise ValueError(
            f"Targets and inputs must be same size. Got ({targets.shape}) and "
            f"({outputs.shape})"
        )
    return _focal_loss_impl(outputs, targets, float(gamma), float(alpha))


def _focal_loss_ref(outputs, targets, gamma=2.0, alpha=0.75):
    """Pure-JAX reference mirroring the PyTorch forward exactly."""
    x = outputs.astype(jnp.float32)
    t = targets.astype(jnp.float32)
    max_val = jnp.maximum(-x, 0.0)
    log_ = jnp.log(jnp.exp(-max_val) + jnp.exp(-x - max_val))
    loss = x - x * t + max_val + log_
    z = -x * (t * 2.0 - 1.0)
    invprobs = jnp.minimum(z, 0.0) - jnp.log1p(jnp.exp(-jnp.abs(z)))
    loss = alpha * jnp.exp(invprobs * gamma) * loss
    return jnp.mean(jnp.sum(loss, axis=-1))


if __name__ == "__main__":
    key = jax.random.PRNGKey(0)
    k1, k2, k3, k4, k5, k6, k7, k8 = jax.random.split(key, 8)

    # NCHW, matching typical segmentation-model outputs fed to this loss.
    shape = (2, 4, 16, 16)
    outputs = jax.random.normal(k1, shape, dtype=jnp.float32)             # logits
    targets = (jax.random.uniform(k2, shape) > 0.5).astype(jnp.float32)   # {0,1}
    loss = jax.block_until_ready(focal_loss(outputs, targets, gamma=2.0, alpha=0.75))
    ref = _focal_loss_ref(outputs, targets, gamma=2.0, alpha=0.75)
    assert jnp.allclose(loss, ref, rtol=1e-5, atol=1e-5), (loss, ref)

    # Ragged element count (fallback path with in-kernel tail masking).
    shape2 = (2, 4, 16, 15)
    o2 = jax.random.normal(k3, shape2, dtype=jnp.float32)
    t2 = (jax.random.uniform(k4, shape2) > 0.5).astype(jnp.float32)
    l2 = jax.block_until_ready(focal_loss(o2, t2))
    r2 = _focal_loss_ref(o2, t2)
    assert jnp.allclose(l2, r2, rtol=1e-5, atol=1e-5), (l2, r2)

    # Lane-aligned last dim (native, relayout-free path) + general-gamma branch.
    shape3 = (2, 4, 8, 128)
    o3 = jax.random.normal(k5, shape3, dtype=jnp.float32)
    t3 = (jax.random.uniform(k6, shape3) > 0.5).astype(jnp.float32)
    l3 = jax.block_until_ready(focal_loss(o3, t3, gamma=1.5, alpha=0.5))
    r3 = _focal_loss_ref(o3, t3, gamma=1.5, alpha=0.5)
    assert jnp.allclose(l3, r3, rtol=1e-5, atol=1e-5), (l3, r3)

    # Native path with a row count that does not fill the last (only) tile
    # (exercises the edge-block row mask).
    shape4 = (3, 5, 128)
    o4 = jax.random.normal(k7, shape4, dtype=jnp.float32)
    t4 = (jax.random.uniform(k8, shape4) > 0.5).astype(jnp.float32)
    l4 = jax.block_until_ready(focal_loss(o4, t4))
    r4 = _focal_loss_ref(o4, t4)
    assert jnp.allclose(l4, r4, rtol=1e-5, atol=1e-5), (l4, r4)

    print("KERNEL_OK")
</pallas_src>

<mosaic_0001>
module attributes {stable_mosaic.version = 11 : i64} {
  func.func @_focal_kernel(%arg0: i32, %arg1: memref<16x128xf32, #tpu.memory_space<vmem>>, %arg2: memref<16x128xf32, #tpu.memory_space<vmem>>, %arg3: memref<8x128xf32, #tpu.memory_space<vmem>>) attributes {dimension_semantics = [#tpu.dimension_semantics<parallel>], iteration_bounds = array<i64: 1>, scalar_prefetch = 0 : i64, scratch_operands = 0 : i64, tpu.core_type = #tpu.core_type<tc>, window_params = [{transform_indices = @transform_0, window_bounds = array<i64: 16, 128>}, {transform_indices = @transform_1, window_bounds = array<i64: 16, 128>}, {transform_indices = @transform_2, window_bounds = array<i64: 8, 128>}]} {
    %cst = arith.constant 0.000000e+00 : f32
    %0 = vector.broadcast %cst : f32 to vector<8x128xf32>
    %c0 = arith.constant 0 : index
    %c0_0 = arith.constant 0 : index
    %1 = vector.load %arg1[%c0, %c0_0] : memref<16x128xf32, #tpu.memory_space<vmem>>, vector<16x128xf32>
    %c0_1 = arith.constant 0 : index
    %c0_2 = arith.constant 0 : index
    %2 = vector.load %arg2[%c0_1, %c0_2] : memref<16x128xf32, #tpu.memory_space<vmem>>, vector<16x128xf32>
    %cst_3 = arith.constant 0.000000e+00 : f32
    %3 = vector.broadcast %cst_3 : f32 to vector<16x128xf32>
    %4 = arith.subf %3, %1 : vector<16x128xf32>
    %cst_4 = arith.constant 0.000000e+00 : f32
    %5 = vector.broadcast %cst_4 : f32 to vector<16x128xf32>
    %6 = arith.maximumf %4, %5 : vector<16x128xf32>
    %7 = math.absf %1 : vector<16x128xf32>
    %cst_5 = arith.constant 0.000000e+00 : f32
    %8 = vector.broadcast %cst_5 : f32 to vector<16x128xf32>
    %9 = arith.subf %8, %7 : vector<16x128xf32>
    %10 = math.exp %9 : vector<16x128xf32>
    %11 = math.log1p %10 : vector<16x128xf32>
    %12 = arith.addf %6, %11 : vector<16x128xf32>
    %13 = arith.mulf %1, %2 : vector<16x128xf32>
    %14 = arith.subf %1, %13 : vector<16x128xf32>
    %15 = arith.addf %14, %12 : vector<16x128xf32>
    %cst_6 = arith.constant 0.000000e+00 : f32
    %16 = vector.broadcast %cst_6 : f32 to vector<16x128xf32>
    %17 = arith.subf %16, %1 : vector<16x128xf32>
    %cst_7 = arith.constant 2.000000e+00 : f32
    %18 = vector.broadcast %cst_7 : f32 to vector<16x128xf32>
    %19 = arith.mulf %2, %18 : vector<16x128xf32>
    %cst_8 = arith.constant 1.000000e+00 : f32
    %20 = vector.broadcast %cst_8 : f32 to vector<16x128xf32>
    %21 = arith.subf %19, %20 : vector<16x128xf32>
    %22 = arith.mulf %17, %21 : vector<16x128xf32>
    %cst_9 = arith.constant -8.000000e+01 : f32
    %23 = vector.broadcast %cst_9 : f32 to vector<16x128xf32>
    %24 = arith.maximumf %22, %23 : vector<16x128xf32>
    %cst_10 = arith.constant 0.000000e+00 : f32
    %25 = vector.broadcast %cst_10 : f32 to vector<16x128xf32>
    %26 = arith.subf %25, %24 : vector<16x128xf32>
    %27 = math.exp %26 : vector<16x128xf32>
    %cst_11 = arith.constant 1.000000e+00 : f32
    %28 = vector.broadcast %cst_11 : f32 to vector<16x128xf32>
    %29 = arith.addf %28, %27 : vector<16x128xf32>
    %cst_12 = arith.constant 1.000000e+00 : f32
    %30 = vector.broadcast %cst_12 : f32 to vector<16x128xf32>
    %31 = arith.divf %30, %29 : vector<16x128xf32>
    %32 = arith.mulf %31, %31 : vector<16x128xf32>
    %cst_13 = arith.constant 7.500000e-01 : f32
    %33 = vector.broadcast %cst_13 : f32 to vector<16x128xf32>
    %34 = arith.mulf %33, %32 : vector<16x128xf32>
    %35 = arith.mulf %34, %15 : vector<16x128xf32>
    %36 = vector.shape_cast %35 : vector<16x128xf32> to vector<2x8x128xf32>
    %cst_14 = arith.constant dense<0.000000e+00> : vector<8x128xf32>
    %37 = vector.multi_reduction <add>, %36, %cst_14 [0] : vector<2x8x128xf32> to vector<8x128xf32>
    %38 = arith.addf %0, %37 : vector<8x128xf32>
    %c0_15 = arith.constant 0 : index
    %c0_16 = arith.constant 0 : index
    %39 = vector.load %arg3[%c0_15, %c0_16] : memref<8x128xf32, #tpu.memory_space<vmem>>, vector<8x128xf32>
    tpu.vector_store %arg3[%c0_15, %c0_16], %38 {strides = array<i32>} : memref<8x128xf32, #tpu.memory_space<vmem>>, vector<8x128xf32>,
    return
  }
  func.func @transform_0(%arg0: i32) -> (i32, i32) {
    %c0_i32 = arith.constant 0 : i32
    %c0_i32_0 = arith.constant 0 : i32
    return %arg0, %c0_i32 : i32, i32
  }
  func.func @transform_1(%arg0: i32) -> (i32, i32) {
    %c0_i32 = arith.constant 0 : i32
    %c0_i32_0 = arith.constant 0 : i32
    return %arg0, %c0_i32 : i32, i32
  }
  func.func @transform_2(%arg0: i32) -> (i32, i32) {
    %c0_i32 = arith.constant 0 : i32
    %c0_i32_0 = arith.constant 0 : i32
    return %arg0, %c0_i32 : i32, i32
  }
}

</mosaic_0001>

<bundles_post_ra>
// kernel: _focal_loss_impl.1
= control target key start
LH: loop header
LB: loop body
LE: loop exit
PB: predicated region body
PF: predicated region fallthrough
CT: control target
= control target key end

     0   :  { %s146_s0 = inlined_call_operand.vmem [shape: f32[16,128], index: 0, kind: input, shape index: {}]   ;;  %s147_s1 = inlined_call_operand.vmem [shape: f32[16,128], index: 1, kind: input, shape index: {}]   ;;  %s148_s2 = inlined_call_operand.vmem [shape: f32[8,128], index: 2, kind: output, shape index: {}]  }
   0x1   :  { %v122_v0 = vld [vmem:[%s146_s0] sm:$0xff]  ;;  %v127_v1 = vld [vmem:[%s146_s0 + $0x8] sm:$0xff] }
   0x2   :  { %v13_v2 = vld [vmem:[%s147_s1] sm:$0xff]  ;;  %v14_v3 = vld [vmem:[%s147_s1 + $0x8] sm:$0xff]  ;;  %v15_v4 = vsub.f32 0.0, %v122_v0  ;;  %v19_v5 = vand.u32 2147483647, %v122_v0  ;;  %v16_v6 = vsub.f32 0.0, %v127_v1 }
   0x3   :  { %v20_v7 = vand.u32 2147483647, %v127_v1  ;;  %v53_v8 = vmul.f32 2.0, %v13_v2  ;;  %v54_v9 = vmul.f32 2.0, %v14_v3  ;;  %v47_v42 = vmul.f32 %v13_v2, %v122_v0 }
   0x4   :  { %v21_v10 = vsub.f32 0.0, %v19_v5  ;;  %v17_v40 = vmax.f32 %v15_v4, 0.0  ;;  %v18_v44 = vmax.f32 %v16_v6, 0.0  ;;  %v48_v46 = vmul.f32 %v14_v3, %v127_v1 }
   0x5   :  { %v22_v11 = vsub.f32 0.0, %v20_v7  ;;  %v86_v12 = vadd.f32 -1.0, %v53_v8  ;;  %v87_v13 = vadd.f32 -1.0, %v54_v9  ;;  %v49_v51 = vsub.f32 %v122_v0, %v47_v42 }
   0x6   :  { %v23_v14 = vmul.f32 1.442695, %v21_v10  ;;  %v50_v53 = vsub.f32 %v127_v1, %v48_v46 }
   0x7   :  { %v25_v15 = vmul.f32 1.442695, %v22_v11  ;;  %v57_v16 = vmul.f32 %v86_v12, %v15_v4  ;;  %v58_v17 = vmul.f32 %v87_v13, %v16_v6 }
   0x8   :  { %88 = vpow2.f32 %v23_v14 }
   0x9   :  { %90 = vpow2.f32 %v25_v15  ;;  %v59_v18 = vmax.f32 %v57_v16, -80.0  ;;  %v60_v19 = vmax.f32 %v58_v17, -80.0 }
   0xb   :  { %v61_v20 = vsub.f32 0.0, %v59_v18  ;;  %v62_v21 = vsub.f32 0.0, %v60_v19 }
   0xd   :  { %v63_v22 = vmul.f32 1.442695, %v61_v20  ;;  %v65_v23 = vmul.f32 1.442695, %v62_v21 }
   0xf   :  { %92 = vpow2.f32 %v63_v22 }
  0x10   :  { %94 = vpow2.f32 %v65_v23 }
  0x12   :  { %v89_v24 = vpop.eup %88 }
  0x13   :  { %v91_v25 = vpop.eup %90  ;;  %v27_v26 = vadd.f32 1.0, %v89_v24  ;;  %v30_v28 = vmul.f32 -0.5, %v89_v24  ;;  %v33_v34 = vand.u32 2147483647, %v89_v24 }
  0x14   :  { %v36_v27 = vadd.f32 1.0, %v91_v25  ;;  %v39_v29 = vmul.f32 -0.5, %v91_v25  ;;  %v42_v37 = vand.u32 2147483647, %v91_v25 }
  0x15   :  { %96 = vlog2.f32 %v27_v26  ;;  %v31_v32 = vadd.f32 1.0, %v30_v28  ;;  %vm34_vm0 = vcmp.lt.f32.partialorder %v33_v34, 0.0004427343 }
  0x16   :  { %98 = vlog2.f32 %v36_v27  ;;  %v40_v35 = vadd.f32 1.0, %v39_v29  ;;  %vm43_vm1 = vcmp.lt.f32.partialorder %v42_v37, 0.0004427343 }
  0x17   :  { %v32_v38 = vmul.f32 %v89_v24, %v31_v32 }
  0x18   :  { %v41_v41 = vmul.f32 %v91_v25, %v40_v35 }
  0x19   :  { %v93_v30 = vpop.eup %92 }
  0x1a   :  { %v95_v31 = vpop.eup %94  ;;  %v67_v33 = vadd.f32 1.0, %v93_v30 }
  0x1b   :  { %v68_v36 = vadd.f32 1.0, %v95_v31 }
  0x1c   :  { %100 = vrcp.f32 %v67_v33 }
  0x1d   :  { %102 = vrcp.f32 %v68_v36 }
  0x1f   :  { %v97_v39 = vpop.eup %96 }
  0x20   :  { %v99_v43 = vpop.eup %98  ;;  %v29_v45 = vmul.f32 0.6931472, %v97_v39 }
  0x21   :  { %v38_v47 = vmul.f32 0.6931472, %v99_v43 }
  0x22   :  { %v35_v48 = vsel %vm34_vm0, %v32_v38, %v29_v45 }
  0x23   :  { %v44_v49 = vsel %vm43_vm1, %v41_v41, %v38_v47  ;;  %v45_v50 = vadd.f32 %v35_v48, %v17_v40 }
  0x24   :  { %v46_v52 = vadd.f32 %v44_v49, %v18_v44 }
  0x25   :  { %v51_v56 = vadd.f32 %v49_v51, %v45_v50 }
  0x26   :  { %v101_v54 = vpop.eup %100  ;;  %v52_v58 = vadd.f32 %v50_v53, %v46_v52 }
  0x27   :  { %v103_v55 = vpop.eup %102  ;;  %v73_v57 = vmul.f32 %v101_v54, %v101_v54 }
  0x28   :  { %v74_v59 = vmul.f32 %v103_v55, %v103_v55 }
  0x29   :  { %v75_v60 = vmul.f32 0.75, %v73_v57 }
  0x2a   :  { %v76_v61 = vmul.f32 0.75, %v74_v59 }
  0x2b   :  { %v77_v62 = vmul.f32 %v75_v60, %v51_v56 }
  0x2c   :  { %v78_v63 = vmul.f32 %v76_v61, %v52_v58 }
  0x2e   :  { %v79_v2 = vadd.f32 %v78_v63, %v77_v62 }
  0x30   :  { %81 = vst [vmem:[%s148_s2] sm:$0xff] %v79_v2 }

</bundles_post_ra>
